<compile_context>
chip_gen: v7x
topology: tpu7x:2x2x1
jax: 0.10.0
libtpu: 0.0.40
codegen_flags: <defaults>
</compile_context>

<pallas_src>
import jax
import jax.numpy as jnp
from jax.experimental import pallas as pl
from jax.experimental.pallas import tpu as pltpu


def _round_up(x, m):
    return (x + m - 1) // m * m


def _pick_tk(kp, max_tk=6400):
    """Largest multiple of 128 that is <= max_tk and divides kp exactly."""
    if kp <= max_tk:
        return kp
    tk = (max_tk // 128) * 128
    while tk > 128 and kp % tk != 0:
        tk -= 128
    return tk


def _pick_tb(batch):
    """Batch tile: as large as possible to amortize W1 streaming, but keep
    >= 2 tiles for large batches so the 'parallel' axis spans both v7x TCs."""
    b8 = _round_up(batch, 8)
    if b8 <= 256:
        return b8
    half = max(256, (b8 // 2) // 8 * 8)
    return min(1024, half)


# ----------------------------------------------------------------------------
# In-kernel exact GELU (nn.GELU() default uses erf).  erf is evaluated with the
# Abramowitz & Stegun 7.1.26 polynomial (|abs err| <= 1.5e-7) so only
# exp / mul / add / compare / select are required from the Mosaic lowering.
# ----------------------------------------------------------------------------
def _erf_poly(x):
    a1, a2, a3, a4, a5 = (0.254829592, -0.284496736, 1.421413741,
                          -1.453152027, 1.061405429)
    p = 0.3275911
    sign = jnp.where(x >= 0.0, 1.0, -1.0)
    z = jnp.abs(x)
    t = 1.0 / (1.0 + p * z)
    poly = ((((a5 * t + a4) * t + a3) * t + a2) * t + a1) * t
    return sign * (1.0 - poly * jnp.exp(-z * z))


def _gelu_exact(x):
    return 0.5 * x * (1.0 + _erf_poly(x * 0.7071067811865476))


# ----------------------------------------------------------------------------
# Pallas kernel: ProjectionHead + L2 normalisation
#   h  = x @ W1 + b1                  (K-tiled, accumulated in f32 scratch)
#   g  = GELU(h)                      (exact erf GELU, matches nn.GELU())
#   y  = g @ W2 + b2                  (dropout is identity in eval mode)
#   y  = y + h
#   y  = LayerNorm(y) * gamma + beta  (eps = 1e-5, biased var, last dim)
#   out = y / ||y||_2                 (per-row L2 norm)
#
# grid = (batch_tiles, k_tiles); k is the reduction ("arbitrary", last) axis.
# ----------------------------------------------------------------------------
def _proj_head_norm_kernel(x_ref, w1_ref, bias_ref, w2_ref, o_ref, h_acc_ref):
    k = pl.program_id(1)
    nk = pl.num_programs(1)

    # K-tiled first matmul: bf16 operands, f32 accumulation on the MXU.
    prod = jnp.dot(x_ref[...].astype(jnp.bfloat16),
                   w1_ref[...].astype(jnp.bfloat16),
                   preferred_element_type=jnp.float32)

    @pl.when(k == 0)
    def _():
        h_acc_ref[...] = prod           # direct store: no zero-fill + RMW

    @pl.when(k > 0)
    def _():
        h_acc_ref[...] += prod

    @pl.when(k == nk - 1)
    def _():
        biases = bias_ref[...]          # (4, P) f32: b1, b2, gamma, beta
        b1 = biases[0:1, :]
        b2 = biases[1:2, :]
        gamma = biases[2:3, :]
        beta = biases[3:4, :]

        h = h_acc_ref[...] + b1         # full pre-activation (f32)

        g = _gelu_exact(h)              # exact GELU (erf), f32

        # fc: Linear(P -> P); dropout == identity in eval mode
        y = jnp.dot(g.astype(jnp.bfloat16), w2_ref[...].astype(jnp.bfloat16),
                    preferred_element_type=jnp.float32) + b2

        # residual
        y = y + h

        # LayerNorm over last dim, eps = 1e-5 (PyTorch default, biased var)
        mean = jnp.mean(y, axis=-1, keepdims=True)
        var = jnp.mean((y - mean) * (y - mean), axis=-1, keepdims=True)
        y = (y - mean) * jax.lax.rsqrt(var + 1e-5)
        y = y * gamma + beta

        # L2 normalisation (text / text.norm(dim=-1, keepdim=True)).  The
        # where-guard only affects all-zero padded batch rows (avoids NaNs in
        # the padded tail); real rows keep PyTorch's epsilon-free semantics.
        nsq = jnp.sum(y * y, axis=-1, keepdims=True)
        inv_norm = jax.lax.rsqrt(jnp.where(nsq > 0.0, nsq, 1.0))
        o_ref[...] = (y * inv_norm).astype(o_ref.dtype)


# ----------------------------------------------------------------------------
# Wrapper: tiling + pallas_call plumbing
# ----------------------------------------------------------------------------
def projection_head_l2norm(x, params):
    """Run the Pallas ProjectionHead+norm kernel on features x: [B, K]."""
    w1, w2, bias_pack = params
    B, K = x.shape
    Kp, P = w1.shape                    # W1 was padded once at construction

    TB = _pick_tb(B)
    TK = _pick_tk(Kp)                   # divides Kp exactly (6400 for 32000)
    Bp = _round_up(B, TB)

    # bf16 activations halve the x DMA footprint; matmul accumulates in f32.
    x = x.astype(jnp.bfloat16)
    if (Bp, Kp) != (B, K):
        x = jnp.pad(x, ((0, Bp - B), (0, Kp - K)))

    grid = (Bp // TB, Kp // TK)

    # Per-step VMEM budget (double-buffered inputs/outputs + f32 accumulator).
    tile_bytes = (
        2 * (TB * TK * 2)      # x tile, bf16, x2 buffers
        + 2 * (TK * P * 2)     # w1 tile, bf16, x2 buffers
        + 2 * (P * P * 2)      # w2, bf16, x2 buffers
        + 2 * (4 * P * 4)      # packed biases, f32, x2 buffers
        + 2 * (TB * P * 4)     # output tile, f32, x2 buffers
        + (TB * P * 4)         # accumulator scratch
    )
    # Cap well below v7x's 64 MiB physical VMEM per TensorCore (headroom for
    # Mosaic internal scratch); plenty for v5e/v6e's 128 MiB.
    vmem_limit = int(min(48 * 1024 * 1024,
                         max(tile_bytes + (8 << 20), 32 * 1024 * 1024)))

    n_batch_tiles = Bp // TB
    cost = pl.CostEstimate(
        flops=2 * Bp * (Kp * P + P * P),
        transcendentals=Bp * P,
        bytes_accessed=(Bp * Kp * 2                       # x streamed once
                        + Kp * P * 2 * n_batch_tiles      # W1 re-read per tile
                        + P * P * 2 + 4 * P * 4
                        + Bp * P * 4),
    )

    out = pl.pallas_call(
        _proj_head_norm_kernel,
        out_shape=jax.ShapeDtypeStruct((Bp, P), jnp.float32),
        grid_spec=pltpu.PrefetchScalarGridSpec(
            num_scalar_prefetch=0,
            grid=grid,
            in_specs=[
                pl.BlockSpec((TB, TK), lambda i, k: (i, k)),   # x
                pl.BlockSpec((TK, P), lambda i, k: (k, 0)),    # w1 (K-tiled)
                pl.BlockSpec((4, P), lambda i, k: (0, 0)),     # b1/b2/gamma/beta
                pl.BlockSpec((P, P), lambda i, k: (0, 0)),     # w2
            ],
            out_specs=pl.BlockSpec((TB, P), lambda i, k: (i, 0)),
            scratch_shapes=[pltpu.VMEM((TB, P), jnp.float32)],
        ),
        compiler_params=pltpu.CompilerParams(
            dimension_semantics=("parallel", "arbitrary"),
            vmem_limit_bytes=vmem_limit,
        ),
        cost_estimate=cost,
    )(x, w1, bias_pack, w2)

    return out[:B]


# ----------------------------------------------------------------------------
# Parameter construction (deterministic, synthetic — no checkpoint loading).
# W1's K dimension is padded here, ONCE, so the forward pass never copies it.
# ----------------------------------------------------------------------------
def make_projection_head_params(key, embedding_dim, projection_dim):
    # LayerNorm / L2 norm are computed over the full last dim inside the
    # kernel, so projection_dim must be lane-aligned and unpadded.
    assert projection_dim % 128 == 0, "projection_dim must be a multiple of 128"
    k1, k2 = jax.random.split(key, 2)
    # stored as [in, out] (transposed vs. nn.Linear.weight) so the kernel
    # computes x @ W + b directly.  Weights kept in bf16 (MXU-native).
    w1 = (jax.random.normal(k1, (embedding_dim, projection_dim), jnp.float32)
          * 0.02).astype(jnp.bfloat16)
    w2 = (jax.random.normal(k2, (projection_dim, projection_dim), jnp.float32)
          * 0.02).astype(jnp.bfloat16)
    kp = _round_up(embedding_dim, 128)
    if kp != embedding_dim:
        w1 = jnp.pad(w1, ((0, kp - embedding_dim), (0, 0)))
    b1 = jnp.zeros((projection_dim,), jnp.float32)
    b2 = jnp.zeros((projection_dim,), jnp.float32)
    gamma = jnp.ones((projection_dim,), jnp.float32)
    beta = jnp.zeros((projection_dim,), jnp.float32)
    bias_pack = jnp.stack([b1, b2, gamma, beta], axis=0)       # (4, P) f32
    return (w1, w2, bias_pack)


# ----------------------------------------------------------------------------
# Clip forward (glue + Pallas kernels); one jit so both branches overlap
# ----------------------------------------------------------------------------
@jax.jit
def clip_forward(token_ids, image, attention_mask,
                 tok_emb, img_enc_w, text_params, img_params):
    # TODO(synk): the real text_encoder (DecoderOnlyTransformer / AutoModel
    # with causal mask from boolean_triangular_mask) is an injected external
    # module; emulated here by an embedding lookup, taking last-token features.
    text_feats = jnp.take(tok_emb, token_ids, axis=0)          # [B, T, Dt]
    text_last = text_feats[:, -1, :]                           # logits[:, -1, :]

    # TODO(synk): the real image_encoder is an injected timm model; emulated by
    # global-average-pooling the NCHW image and a linear lift to image_hidden.
    img_pooled = jnp.mean(image, axis=(2, 3))                  # [B, C]
    img_encoded = img_pooled @ img_enc_w                       # [B, Di]

    text_out = projection_head_l2norm(text_last, text_params)  # [B, P] unit rows
    img_out = projection_head_l2norm(img_encoded, img_params)  # [B, P] unit rows
    return text_out, img_out


if __name__ == "__main__":
    # small shapes consistent with the module
    B = 8            # batch
    T = 8            # sequence length
    VOCAB = 64       # vocab size (stand-in)
    TEXT_HIDDEN = 128    # stand-in for text_hidden_dim (32000 in config)
    IMG_C, IMG_H, IMG_W = 4, 16, 16
    IMG_HIDDEN = 256     # stand-in for image_hidden_dim (1280 in config)
    PROJ_DIM = 128       # stand-in for projection_dim (256 in config)

    key = jax.random.PRNGKey(0)
    k_tok, k_img, k_temb, k_ienc, k_tp, k_ip = jax.random.split(key, 6)

    token_ids = jax.random.randint(k_tok, (B, T), 0, VOCAB, dtype=jnp.int32)
    image = jax.random.normal(k_img, (B, IMG_C, IMG_H, IMG_W), jnp.float32)  # NCHW
    attention_mask = jnp.ones((B, T), jnp.int32)

    # stand-in encoder parameters
    tok_emb = jax.random.normal(k_temb, (VOCAB, TEXT_HIDDEN), jnp.float32) * 0.02
    img_enc_w = jax.random.normal(k_ienc, (IMG_C, IMG_HIDDEN), jnp.float32) * 0.02

    # projection-head parameters
    text_params = make_projection_head_params(k_tp, TEXT_HIDDEN, PROJ_DIM)
    img_params = make_projection_head_params(k_ip, IMG_HIDDEN, PROJ_DIM)

    text_features, image_features = clip_forward(
        token_ids, image, attention_mask,
        tok_emb, img_enc_w, text_params, img_params)

    jax.block_until_ready((text_features, image_features))

    assert text_features.shape == (B, PROJ_DIM)
    assert image_features.shape == (B, PROJ_DIM)
    # rows must be unit-norm and finite
    assert bool(jnp.all(jnp.isfinite(text_features)))
    assert bool(jnp.all(jnp.isfinite(image_features)))
    assert jnp.allclose(jnp.linalg.norm(text_features, axis=-1), 1.0, atol=1e-3)
    assert jnp.allclose(jnp.linalg.norm(image_features, axis=-1), 1.0, atol=1e-3)

    print("KERNEL_OK")
</pallas_src>

<mosaic_0001>
module attributes {stable_mosaic.version = 11 : i64} {
  func.func @_proj_head_norm_kernel(%arg0: i32, %arg1: i32, %arg2: memref<8x128xbf16, #tpu.memory_space<vmem>>, %arg3: memref<128x128xbf16, #tpu.memory_space<vmem>>, %arg4: memref<4x128xf32, #tpu.memory_space<vmem>>, %arg5: memref<128x128xbf16, #tpu.memory_space<vmem>>, %arg6: memref<8x128xf32, #tpu.memory_space<vmem>>, %arg7: memref<8x128xf32, #tpu.memory_space<vmem>>) attributes {dimension_semantics = [#tpu.dimension_semantics<parallel>, #tpu.dimension_semantics<arbitrary>], iteration_bounds = array<i64: 1, 1>, scalar_prefetch = 0 : i64, scratch_operands = 1 : i64, tpu.core_type = #tpu.core_type<tc>, window_params = [{transform_indices = @transform_0, window_bounds = array<i64: 8, 128>}, {transform_indices = @transform_1, window_bounds = array<i64: 128, 128>}, {pipeline_mode = #tpu.pipeline_mode<synchronous>, transform_indices = @transform_2, window_bounds = array<i64: 4, 128>}, {pipeline_mode = #tpu.pipeline_mode<synchronous>, transform_indices = @transform_3, window_bounds = array<i64: 128, 128>}, {transform_indices = @transform_4, window_bounds = array<i64: 8, 128>}]} {
    %c0 = arith.constant 0 : index
    %c0_0 = arith.constant 0 : index
    %0 = vector.load %arg2[%c0, %c0_0] : memref<8x128xbf16, #tpu.memory_space<vmem>>, vector<8x128xbf16>
    %c0_1 = arith.constant 0 : index
    %c0_2 = arith.constant 0 : index
    %1 = vector.load %arg3[%c0_1, %c0_2] : memref<128x128xbf16, #tpu.memory_space<vmem>>, vector<128x128xbf16>
    %cst = arith.constant dense<0.000000e+00> : vector<8x128xf32>
    %2 = tpu.matmul %0, %1, %cst {dimension_numbers = #tpu.dot_dimension_numbers<[1], [0], [0], [1], [0, 0, 1, 1], [], []>} : vector<8x128xbf16>, vector<128x128xbf16>, vector<8x128xf32> -> vector<8x128xf32>
    %c0_i32 = arith.constant 0 : i32
    %3 = arith.cmpi eq, %arg1, %c0_i32 : i32
    %4 = arith.extui %3 : i1 to i32
    %c0_i32_3 = arith.constant 0 : i32
    %5 = arith.cmpi ne, %4, %c0_i32_3 : i32
    scf.if %5 {
      %c0_8 = arith.constant 0 : index
      %c0_9 = arith.constant 0 : index
      %12 = vector.load %arg7[%c0_8, %c0_9] : memref<8x128xf32, #tpu.memory_space<vmem>>, vector<8x128xf32>
      tpu.vector_store %arg7[%c0_8, %c0_9], %2 {strides = array<i32>} : memref<8x128xf32, #tpu.memory_space<vmem>>, vector<8x128xf32>,
    } else {
    }
    %c0_i32_4 = arith.constant 0 : i32
    %6 = arith.cmpi sgt, %arg1, %c0_i32_4 : i32
    %7 = arith.extui %6 : i1 to i32
    %c0_i32_5 = arith.constant 0 : i32
    %8 = arith.cmpi ne, %7, %c0_i32_5 : i32
    scf.if %8 {
      %c0_8 = arith.constant 0 : index
      %c0_9 = arith.constant 0 : index
      %12 = vector.load %arg7[%c0_8, %c0_9] : memref<8x128xf32, #tpu.memory_space<vmem>>, vector<8x128xf32>
      %13 = arith.addf %12, %2 : vector<8x128xf32>
      %c0_10 = arith.constant 0 : index
      %c0_11 = arith.constant 0 : index
      %14 = vector.load %arg7[%c0_10, %c0_11] : memref<8x128xf32, #tpu.memory_space<vmem>>, vector<8x128xf32>
      tpu.vector_store %arg7[%c0_10, %c0_11], %13 {strides = array<i32>} : memref<8x128xf32, #tpu.memory_space<vmem>>, vector<8x128xf32>,
    } else {
    }
    %c0_i32_6 = arith.constant 0 : i32
    %9 = arith.cmpi eq, %arg1, %c0_i32_6 : i32
    %10 = arith.extui %9 : i1 to i32
    %c0_i32_7 = arith.constant 0 : i32
    %11 = arith.cmpi ne, %10, %c0_i32_7 : i32
    scf.if %11 {
      %c0_8 = arith.constant 0 : index
      %c0_9 = arith.constant 0 : index
      %12 = vector.load %arg4[%c0_8, %c0_9] : memref<4x128xf32, #tpu.memory_space<vmem>>, vector<4x128xf32>
      %13 = vector.extract_strided_slice %12 {offsets = [0, 0], sizes = [1, 128], strides = [1, 1]} : vector<4x128xf32> to vector<1x128xf32>
      %14 = vector.extract_strided_slice %12 {offsets = [1, 0], sizes = [1, 128], strides = [1, 1]} : vector<4x128xf32> to vector<1x128xf32>
      %15 = vector.extract_strided_slice %12 {offsets = [2, 0], sizes = [1, 128], strides = [1, 1]} : vector<4x128xf32> to vector<1x128xf32>
      %16 = vector.extract_strided_slice %12 {offsets = [3, 0], sizes = [1, 128], strides = [1, 1]} : vector<4x128xf32> to vector<1x128xf32>
      %c0_10 = arith.constant 0 : index
      %c0_11 = arith.constant 0 : index
      %17 = vector.load %arg7[%c0_10, %c0_11] : memref<8x128xf32, #tpu.memory_space<vmem>>, vector<8x128xf32>
      %18 = vector.broadcast %13 : vector<1x128xf32> to vector<8x128xf32>
      %19 = arith.addf %17, %18 : vector<8x128xf32>
      %cst_12 = arith.constant 5.000000e-01 : f32
      %20 = vector.broadcast %cst_12 : f32 to vector<8x128xf32>
      %21 = arith.mulf %20, %19 : vector<8x128xf32>
      %cst_13 = arith.constant 0.707106769 : f32
      %22 = vector.broadcast %cst_13 : f32 to vector<8x128xf32>
      %23 = arith.mulf %19, %22 : vector<8x128xf32>
      %cst_14 = arith.constant 0.000000e+00 : f32
      %24 = vector.broadcast %cst_14 : f32 to vector<8x128xf32>
      %25 = arith.cmpf oge, %23, %24 : vector<8x128xf32>
      %cst_15 = arith.constant 1.000000e+00 : f32
      %cst_16 = arith.constant -1.000000e+00 : f32
      %26 = vector.broadcast %cst_15 : f32 to vector<8x128xf32>
      %27 = vector.broadcast %cst_16 : f32 to vector<8x128xf32>
      %28 = arith.select %25, %26, %27 : vector<8x128xi1>, vector<8x128xf32>
      %29 = math.absf %23 : vector<8x128xf32>
      %cst_17 = arith.constant 0.327591091 : f32
      %30 = vector.broadcast %cst_17 : f32 to vector<8x128xf32>
      %31 = arith.mulf %30, %29 : vector<8x128xf32>
      %cst_18 = arith.constant 1.000000e+00 : f32
      %32 = vector.broadcast %cst_18 : f32 to vector<8x128xf32>
      %33 = arith.addf %32, %31 : vector<8x128xf32>
      %cst_19 = arith.constant 1.000000e+00 : f32
      %34 = vector.broadcast %cst_19 : f32 to vector<8x128xf32>
      %35 = arith.divf %34, %33 : vector<8x128xf32>
      %cst_20 = arith.constant 1.06140542 : f32
      %36 = vector.broadcast %cst_20 : f32 to vector<8x128xf32>
      %37 = arith.mulf %36, %35 : vector<8x128xf32>
      %cst_21 = arith.constant -1.45315206 : f32
      %38 = vector.broadcast %cst_21 : f32 to vector<8x128xf32>
      %39 = arith.addf %37, %38 : vector<8x128xf32>
      %40 = arith.mulf %39, %35 : vector<8x128xf32>
      %cst_22 = arith.constant 1.42141378 : f32
      %41 = vector.broadcast %cst_22 : f32 to vector<8x128xf32>
      %42 = arith.addf %40, %41 : vector<8x128xf32>
      %43 = arith.mulf %42, %35 : vector<8x128xf32>
      %cst_23 = arith.constant -0.284496725 : f32
      %44 = vector.broadcast %cst_23 : f32 to vector<8x128xf32>
      %45 = arith.addf %43, %44 : vector<8x128xf32>
      %46 = arith.mulf %45, %35 : vector<8x128xf32>
      %cst_24 = arith.constant 0.254829586 : f32
      %47 = vector.broadcast %cst_24 : f32 to vector<8x128xf32>
      %48 = arith.addf %46, %47 : vector<8x128xf32>
      %49 = arith.mulf %48, %35 : vector<8x128xf32>
      %cst_25 = arith.constant 0.000000e+00 : f32
      %50 = vector.broadcast %cst_25 : f32 to vector<8x128xf32>
      %51 = arith.subf %50, %29 : vector<8x128xf32>
      %52 = arith.mulf %51, %29 : vector<8x128xf32>
      %53 = math.exp %52 : vector<8x128xf32>
      %54 = arith.mulf %49, %53 : vector<8x128xf32>
      %cst_26 = arith.constant 1.000000e+00 : f32
      %55 = vector.broadcast %cst_26 : f32 to vector<8x128xf32>
      %56 = arith.subf %55, %54 : vector<8x128xf32>
      %57 = arith.mulf %28, %56 : vector<8x128xf32>
      %cst_27 = arith.constant 1.000000e+00 : f32
      %58 = vector.broadcast %cst_27 : f32 to vector<8x128xf32>
      %59 = arith.addf %58, %57 : vector<8x128xf32>
      %60 = arith.mulf %21, %59 : vector<8x128xf32>
      %61 = arith.truncf %60 : vector<8x128xf32> to vector<8x128xbf16>
      %c0_28 = arith.constant 0 : index
      %c0_29 = arith.constant 0 : index
      %62 = vector.load %arg5[%c0_28, %c0_29] : memref<128x128xbf16, #tpu.memory_space<vmem>>, vector<128x128xbf16>
      %cst_30 = arith.constant dense<0.000000e+00> : vector<8x128xf32>
      %63 = tpu.matmul %61, %62, %cst_30 {dimension_numbers = #tpu.dot_dimension_numbers<[1], [0], [0], [1], [0, 0, 1, 1], [], []>} : vector<8x128xbf16>, vector<128x128xbf16>, vector<8x128xf32> -> vector<8x128xf32>
      %64 = vector.broadcast %14 : vector<1x128xf32> to vector<8x128xf32>
      %65 = arith.addf %63, %64 : vector<8x128xf32>
      %66 = arith.addf %65, %19 : vector<8x128xf32>
      %cst_31 = arith.constant dense<0.000000e+00> : vector<8xf32>
      %67 = vector.multi_reduction <add>, %66, %cst_31 [1] : vector<8x128xf32> to vector<8xf32>
      %68 = vector.shape_cast %67 : vector<8xf32> to vector<8x1xf32>
      %cst_32 = arith.constant 1.280000e+02 : f32
      %69 = vector.broadcast %cst_32 : f32 to vector<8x1xf32>
      %70 = arith.divf %68, %69 : vector<8x1xf32>
      %71 = vector.broadcast %70 : vector<8x1xf32> to vector<8x128xf32>
      %72 = arith.subf %66, %71 : vector<8x128xf32>
      %73 = vector.broadcast %70 : vector<8x1xf32> to vector<8x128xf32>
      %74 = arith.subf %66, %73 : vector<8x128xf32>
      %75 = arith.mulf %72, %74 : vector<8x128xf32>
      %cst_33 = arith.constant dense<0.000000e+00> : vector<8xf32>
      %76 = vector.multi_reduction <add>, %75, %cst_33 [1] : vector<8x128xf32> to vector<8xf32>
      %77 = vector.shape_cast %76 : vector<8xf32> to vector<8x1xf32>
      %cst_34 = arith.constant 1.280000e+02 : f32
      %78 = vector.broadcast %cst_34 : f32 to vector<8x1xf32>
      %79 = arith.divf %77, %78 : vector<8x1xf32>
      %80 = vector.broadcast %70 : vector<8x1xf32> to vector<8x128xf32>
      %81 = arith.subf %66, %80 : vector<8x128xf32>
      %cst_35 = arith.constant 9.99999974E-6 : f32
      %82 = vector.broadcast %cst_35 : f32 to vector<8x1xf32>
      %83 = arith.addf %79, %82 : vector<8x1xf32>
      %84 = math.rsqrt %83 : vector<8x1xf32>
      %85 = vector.broadcast %84 : vector<8x1xf32> to vector<8x128xf32>
      %86 = arith.mulf %81, %85 : vector<8x128xf32>
      %87 = vector.broadcast %15 : vector<1x128xf32> to vector<8x128xf32>
      %88 = arith.mulf %86, %87 : vector<8x128xf32>
      %89 = vector.broadcast %16 : vector<1x128xf32> to vector<8x128xf32>
      %90 = arith.addf %88, %89 : vector<8x128xf32>
      %91 = arith.mulf %90, %90 : vector<8x128xf32>
      %cst_36 = arith.constant dense<0.000000e+00> : vector<8xf32>
      %92 = vector.multi_reduction <add>, %91, %cst_36 [1] : vector<8x128xf32> to vector<8xf32>
      %93 = vector.shape_cast %92 : vector<8xf32> to vector<8x1xf32>
      %cst_37 = arith.constant 0.000000e+00 : f32
      %94 = vector.broadcast %cst_37 : f32 to vector<8x1xf32>
      %95 = arith.cmpf ogt, %93, %94 : vector<8x1xf32>
      %cst_38 = arith.constant 1.000000e+00 : f32
      %96 = vector.broadcast %cst_38 : f32 to vector<8x1xf32>
      %97 = arith.select %95, %93, %96 : vector<8x1xi1>, vector<8x1xf32>
      %98 = math.rsqrt %97 : vector<8x1xf32>
      %99 = vector.broadcast %98 : vector<8x1xf32> to vector<8x128xf32>
      %100 = arith.mulf %90, %99 : vector<8x128xf32>
      %c0_39 = arith.constant 0 : index
      %c0_40 = arith.constant 0 : index
      %101 = vector.load %arg6[%c0_39, %c0_40] : memref<8x128xf32, #tpu.memory_space<vmem>>, vector<8x128xf32>
      tpu.vector_store %arg6[%c0_39, %c0_40], %100 {strides = array<i32>} : memref<8x128xf32, #tpu.memory_space<vmem>>, vector<8x128xf32>,
    } else {
    }
    return
  }
  func.func @transform_0(%arg0: i32, %arg1: i32) -> (i32, i32) {
    %c0_i32 = arith.constant 0 : i32
    return %arg0, %arg1 : i32, i32
  }
  func.func @transform_1(%arg0: i32, %arg1: i32) -> (i32, i32) {
    %c0_i32 = arith.constant 0 : i32
    %c0_i32_0 = arith.constant 0 : i32
    return %arg1, %c0_i32 : i32, i32
  }
  func.func @transform_2(%arg0: i32, %arg1: i32) -> (i32, i32) {
    %c0_i32 = arith.constant 0 : i32
    %c0_i32_0 = arith.constant 0 : i32
    %c0_i32_1 = arith.constant 0 : i32
    return %c0_i32, %c0_i32_0 : i32, i32
  }
  func.func @transform_3(%arg0: i32, %arg1: i32) -> (i32, i32) {
    %c0_i32 = arith.constant 0 : i32
    %c0_i32_0 = arith.constant 0 : i32
    %c0_i32_1 = arith.constant 0 : i32
    return %c0_i32, %c0_i32_0 : i32, i32
  }
  func.func @transform_4(%arg0: i32, %arg1: i32) -> (i32, i32) {
    %c0_i32 = arith.constant 0 : i32
    %c0_i32_0 = arith.constant 0 : i32
    return %arg0, %c0_i32 : i32, i32
  }
}

module attributes {stable_mosaic.version = 11 : i64} {
  func.func @_proj_head_norm_kernel(%arg0: i32, %arg1: i32, %arg2: memref<8x256xbf16, #tpu.memory_space<vmem>>, %arg3: memref<256x128xbf16, #tpu.memory_space<vmem>>, %arg4: memref<4x128xf32, #tpu.memory_space<vmem>>, %arg5: memref<128x128xbf16, #tpu.memory_space<vmem>>, %arg6: memref<8x128xf32, #tpu.memory_space<vmem>>, %arg7: memref<8x128xf32, #tpu.memory_space<vmem>>) attributes {dimension_semantics = [#tpu.dimension_semantics<parallel>, #tpu.dimension_semantics<arbitrary>], iteration_bounds = array<i64: 1, 1>, scalar_prefetch = 0 : i64, scratch_operands = 1 : i64, tpu.core_type = #tpu.core_type<tc>, window_params = [{transform_indices = @transform_0, window_bounds = array<i64: 8, 256>}, {transform_indices = @transform_1, window_bounds = array<i64: 256, 128>}, {pipeline_mode = #tpu.pipeline_mode<synchronous>, transform_indices = @transform_2, window_bounds = array<i64: 4, 128>}, {pipeline_mode = #tpu.pipeline_mode<synchronous>, transform_indices = @transform_3, window_bounds = array<i64: 128, 128>}, {transform_indices = @transform_4, window_bounds = array<i64: 8, 128>}]} {
    %c0 = arith.constant 0 : index
    %c0_0 = arith.constant 0 : index
    %0 = vector.load %arg2[%c0, %c0_0] : memref<8x256xbf16, #tpu.memory_space<vmem>>, vector<8x256xbf16>
    %c0_1 = arith.constant 0 : index
    %c0_2 = arith.constant 0 : index
    %1 = vector.load %arg3[%c0_1, %c0_2] : memref<256x128xbf16, #tpu.memory_space<vmem>>, vector<256x128xbf16>
    %cst = arith.constant dense<0.000000e+00> : vector<8x128xf32>
    %2 = tpu.matmul %0, %1, %cst {dimension_numbers = #tpu.dot_dimension_numbers<[1], [0], [0], [1], [0, 0, 1, 1], [], []>} : vector<8x256xbf16>, vector<256x128xbf16>, vector<8x128xf32> -> vector<8x128xf32>
    %c0_i32 = arith.constant 0 : i32
    %3 = arith.cmpi eq, %arg1, %c0_i32 : i32
    %4 = arith.extui %3 : i1 to i32
    %c0_i32_3 = arith.constant 0 : i32
    %5 = arith.cmpi ne, %4, %c0_i32_3 : i32
    scf.if %5 {
      %c0_8 = arith.constant 0 : index
      %c0_9 = arith.constant 0 : index
      %12 = vector.load %arg7[%c0_8, %c0_9] : memref<8x128xf32, #tpu.memory_space<vmem>>, vector<8x128xf32>
      tpu.vector_store %arg7[%c0_8, %c0_9], %2 {strides = array<i32>} : memref<8x128xf32, #tpu.memory_space<vmem>>, vector<8x128xf32>,
    } else {
    }
    %c0_i32_4 = arith.constant 0 : i32
    %6 = arith.cmpi sgt, %arg1, %c0_i32_4 : i32
    %7 = arith.extui %6 : i1 to i32
    %c0_i32_5 = arith.constant 0 : i32
    %8 = arith.cmpi ne, %7, %c0_i32_5 : i32
    scf.if %8 {
      %c0_8 = arith.constant 0 : index
      %c0_9 = arith.constant 0 : index
      %12 = vector.load %arg7[%c0_8, %c0_9] : memref<8x128xf32, #tpu.memory_space<vmem>>, vector<8x128xf32>
      %13 = arith.addf %12, %2 : vector<8x128xf32>
      %c0_10 = arith.constant 0 : index
      %c0_11 = arith.constant 0 : index
      %14 = vector.load %arg7[%c0_10, %c0_11] : memref<8x128xf32, #tpu.memory_space<vmem>>, vector<8x128xf32>
      tpu.vector_store %arg7[%c0_10, %c0_11], %13 {strides = array<i32>} : memref<8x128xf32, #tpu.memory_space<vmem>>, vector<8x128xf32>,
    } else {
    }
    %c0_i32_6 = arith.constant 0 : i32
    %9 = arith.cmpi eq, %arg1, %c0_i32_6 : i32
    %10 = arith.extui %9 : i1 to i32
    %c0_i32_7 = arith.constant 0 : i32
    %11 = arith.cmpi ne, %10, %c0_i32_7 : i32
    scf.if %11 {
      %c0_8 = arith.constant 0 : index
      %c0_9 = arith.constant 0 : index
      %12 = vector.load %arg4[%c0_8, %c0_9] : memref<4x128xf32, #tpu.memory_space<vmem>>, vector<4x128xf32>
      %13 = vector.extract_strided_slice %12 {offsets = [0, 0], sizes = [1, 128], strides = [1, 1]} : vector<4x128xf32> to vector<1x128xf32>
      %14 = vector.extract_strided_slice %12 {offsets = [1, 0], sizes = [1, 128], strides = [1, 1]} : vector<4x128xf32> to vector<1x128xf32>
      %15 = vector.extract_strided_slice %12 {offsets = [2, 0], sizes = [1, 128], strides = [1, 1]} : vector<4x128xf32> to vector<1x128xf32>
      %16 = vector.extract_strided_slice %12 {offsets = [3, 0], sizes = [1, 128], strides = [1, 1]} : vector<4x128xf32> to vector<1x128xf32>
      %c0_10 = arith.constant 0 : index
      %c0_11 = arith.constant 0 : index
      %17 = vector.load %arg7[%c0_10, %c0_11] : memref<8x128xf32, #tpu.memory_space<vmem>>, vector<8x128xf32>
      %18 = vector.broadcast %13 : vector<1x128xf32> to vector<8x128xf32>
      %19 = arith.addf %17, %18 : vector<8x128xf32>
      %cst_12 = arith.constant 5.000000e-01 : f32
      %20 = vector.broadcast %cst_12 : f32 to vector<8x128xf32>
      %21 = arith.mulf %20, %19 : vector<8x128xf32>
      %cst_13 = arith.constant 0.707106769 : f32
      %22 = vector.broadcast %cst_13 : f32 to vector<8x128xf32>
      %23 = arith.mulf %19, %22 : vector<8x128xf32>
      %cst_14 = arith.constant 0.000000e+00 : f32
      %24 = vector.broadcast %cst_14 : f32 to vector<8x128xf32>
      %25 = arith.cmpf oge, %23, %24 : vector<8x128xf32>
      %cst_15 = arith.constant 1.000000e+00 : f32
      %cst_16 = arith.constant -1.000000e+00 : f32
      %26 = vector.broadcast %cst_15 : f32 to vector<8x128xf32>
      %27 = vector.broadcast %cst_16 : f32 to vector<8x128xf32>
      %28 = arith.select %25, %26, %27 : vector<8x128xi1>, vector<8x128xf32>
      %29 = math.absf %23 : vector<8x128xf32>
      %cst_17 = arith.constant 0.327591091 : f32
      %30 = vector.broadcast %cst_17 : f32 to vector<8x128xf32>
      %31 = arith.mulf %30, %29 : vector<8x128xf32>
      %cst_18 = arith.constant 1.000000e+00 : f32
      %32 = vector.broadcast %cst_18 : f32 to vector<8x128xf32>
      %33 = arith.addf %32, %31 : vector<8x128xf32>
      %cst_19 = arith.constant 1.000000e+00 : f32
      %34 = vector.broadcast %cst_19 : f32 to vector<8x128xf32>
      %35 = arith.divf %34, %33 : vector<8x128xf32>
      %cst_20 = arith.constant 1.06140542 : f32
      %36 = vector.broadcast %cst_20 : f32 to vector<8x128xf32>
      %37 = arith.mulf %36, %35 : vector<8x128xf32>
      %cst_21 = arith.constant -1.45315206 : f32
      %38 = vector.broadcast %cst_21 : f32 to vector<8x128xf32>
      %39 = arith.addf %37, %38 : vector<8x128xf32>
      %40 = arith.mulf %39, %35 : vector<8x128xf32>
      %cst_22 = arith.constant 1.42141378 : f32
      %41 = vector.broadcast %cst_22 : f32 to vector<8x128xf32>
      %42 = arith.addf %40, %41 : vector<8x128xf32>
      %43 = arith.mulf %42, %35 : vector<8x128xf32>
      %cst_23 = arith.constant -0.284496725 : f32
      %44 = vector.broadcast %cst_23 : f32 to vector<8x128xf32>
      %45 = arith.addf %43, %44 : vector<8x128xf32>
      %46 = arith.mulf %45, %35 : vector<8x128xf32>
      %cst_24 = arith.constant 0.254829586 : f32
      %47 = vector.broadcast %cst_24 : f32 to vector<8x128xf32>
      %48 = arith.addf %46, %47 : vector<8x128xf32>
      %49 = arith.mulf %48, %35 : vector<8x128xf32>
      %cst_25 = arith.constant 0.000000e+00 : f32
      %50 = vector.broadcast %cst_25 : f32 to vector<8x128xf32>
      %51 = arith.subf %50, %29 : vector<8x128xf32>
      %52 = arith.mulf %51, %29 : vector<8x128xf32>
      %53 = math.exp %52 : vector<8x128xf32>
      %54 = arith.mulf %49, %53 : vector<8x128xf32>
      %cst_26 = arith.constant 1.000000e+00 : f32
      %55 = vector.broadcast %cst_26 : f32 to vector<8x128xf32>
      %56 = arith.subf %55, %54 : vector<8x128xf32>
      %57 = arith.mulf %28, %56 : vector<8x128xf32>
      %cst_27 = arith.constant 1.000000e+00 : f32
      %58 = vector.broadcast %cst_27 : f32 to vector<8x128xf32>
      %59 = arith.addf %58, %57 : vector<8x128xf32>
      %60 = arith.mulf %21, %59 : vector<8x128xf32>
      %61 = arith.truncf %60 : vector<8x128xf32> to vector<8x128xbf16>
      %c0_28 = arith.constant 0 : index
      %c0_29 = arith.constant 0 : index
      %62 = vector.load %arg5[%c0_28, %c0_29] : memref<128x128xbf16, #tpu.memory_space<vmem>>, vector<128x128xbf16>
      %cst_30 = arith.constant dense<0.000000e+00> : vector<8x128xf32>
      %63 = tpu.matmul %61, %62, %cst_30 {dimension_numbers = #tpu.dot_dimension_numbers<[1], [0], [0], [1], [0, 0, 1, 1], [], []>} : vector<8x128xbf16>, vector<128x128xbf16>, vector<8x128xf32> -> vector<8x128xf32>
      %64 = vector.broadcast %14 : vector<1x128xf32> to vector<8x128xf32>
      %65 = arith.addf %63, %64 : vector<8x128xf32>
      %66 = arith.addf %65, %19 : vector<8x128xf32>
      %cst_31 = arith.constant dense<0.000000e+00> : vector<8xf32>
      %67 = vector.multi_reduction <add>, %66, %cst_31 [1] : vector<8x128xf32> to vector<8xf32>
      %68 = vector.shape_cast %67 : vector<8xf32> to vector<8x1xf32>
      %cst_32 = arith.constant 1.280000e+02 : f32
      %69 = vector.broadcast %cst_32 : f32 to vector<8x1xf32>
      %70 = arith.divf %68, %69 : vector<8x1xf32>
      %71 = vector.broadcast %70 : vector<8x1xf32> to vector<8x128xf32>
      %72 = arith.subf %66, %71 : vector<8x128xf32>
      %73 = vector.broadcast %70 : vector<8x1xf32> to vector<8x128xf32>
      %74 = arith.subf %66, %73 : vector<8x128xf32>
      %75 = arith.mulf %72, %74 : vector<8x128xf32>
      %cst_33 = arith.constant dense<0.000000e+00> : vector<8xf32>
      %76 = vector.multi_reduction <add>, %75, %cst_33 [1] : vector<8x128xf32> to vector<8xf32>
      %77 = vector.shape_cast %76 : vector<8xf32> to vector<8x1xf32>
      %cst_34 = arith.constant 1.280000e+02 : f32
      %78 = vector.broadcast %cst_34 : f32 to vector<8x1xf32>
      %79 = arith.divf %77, %78 : vector<8x1xf32>
      %80 = vector.broadcast %70 : vector<8x1xf32> to vector<8x128xf32>
      %81 = arith.subf %66, %80 : vector<8x128xf32>
      %cst_35 = arith.constant 9.99999974E-6 : f32
      %82 = vector.broadcast %cst_35 : f32 to vector<8x1xf32>
      %83 = arith.addf %79, %82 : vector<8x1xf32>
      %84 = math.rsqrt %83 : vector<8x1xf32>
      %85 = vector.broadcast %84 : vector<8x1xf32> to vector<8x128xf32>
      %86 = arith.mulf %81, %85 : vector<8x128xf32>
      %87 = vector.broadcast %15 : vector<1x128xf32> to vector<8x128xf32>
      %88 = arith.mulf %86, %87 : vector<8x128xf32>
      %89 = vector.broadcast %16 : vector<1x128xf32> to vector<8x128xf32>
      %90 = arith.addf %88, %89 : vector<8x128xf32>
      %91 = arith.mulf %90, %90 : vector<8x128xf32>
      %cst_36 = arith.constant dense<0.000000e+00> : vector<8xf32>
      %92 = vector.multi_reduction <add>, %91, %cst_36 [1] : vector<8x128xf32> to vector<8xf32>
      %93 = vector.shape_cast %92 : vector<8xf32> to vector<8x1xf32>
      %cst_37 = arith.constant 0.000000e+00 : f32
      %94 = vector.broadcast %cst_37 : f32 to vector<8x1xf32>
      %95 = arith.cmpf ogt, %93, %94 : vector<8x1xf32>
      %cst_38 = arith.constant 1.000000e+00 : f32
      %96 = vector.broadcast %cst_38 : f32 to vector<8x1xf32>
      %97 = arith.select %95, %93, %96 : vector<8x1xi1>, vector<8x1xf32>
      %98 = math.rsqrt %97 : vector<8x1xf32>
      %99 = vector.broadcast %98 : vector<8x1xf32> to vector<8x128xf32>
      %100 = arith.mulf %90, %99 : vector<8x128xf32>
      %c0_39 = arith.constant 0 : index
      %c0_40 = arith.constant 0 : index
      %101 = vector.load %arg6[%c0_39, %c0_40] : memref<8x128xf32, #tpu.memory_space<vmem>>, vector<8x128xf32>
      tpu.vector_store %arg6[%c0_39, %c0_40], %100 {strides = array<i32>} : memref<8x128xf32, #tpu.memory_space<vmem>>, vector<8x128xf32>,
    } else {
    }
    return
  }
  func.func @transform_0(%arg0: i32, %arg1: i32) -> (i32, i32) {
    %c0_i32 = arith.constant 0 : i32
    return %arg0, %arg1 : i32, i32
  }
  func.func @transform_1(%arg0: i32, %arg1: i32) -> (i32, i32) {
    %c0_i32 = arith.constant 0 : i32
    %c0_i32_0 = arith.constant 0 : i32
    return %arg1, %c0_i32 : i32, i32
  }
  func.func @transform_2(%arg0: i32, %arg1: i32) -> (i32, i32) {
    %c0_i32 = arith.constant 0 : i32
    %c0_i32_0 = arith.constant 0 : i32
    %c0_i32_1 = arith.constant 0 : i32
    return %c0_i32, %c0_i32_0 : i32, i32
  }
  func.func @transform_3(%arg0: i32, %arg1: i32) -> (i32, i32) {
    %c0_i32 = arith.constant 0 : i32
    %c0_i32_0 = arith.constant 0 : i32
    %c0_i32_1 = arith.constant 0 : i32
    return %c0_i32, %c0_i32_0 : i32, i32
  }
  func.func @transform_4(%arg0: i32, %arg1: i32) -> (i32, i32) {
    %c0_i32 = arith.constant 0 : i32
    %c0_i32_0 = arith.constant 0 : i32
    return %arg0, %c0_i32 : i32, i32
  }
}

</mosaic_0001>

<bundles_post_ra>
// kernel: clip_forward.2
= control target key start
LH: loop header
LB: loop body
LE: loop exit
PB: predicated region body
PF: predicated region fallthrough
CT: control target
= control target key end

     0   :  { %9 = vsyncpa [#allocation4], 0  ;;  %s667_s0 = inlined_call_operand.vmem [shape: bf16[8,128], index: 0, kind: input, shape index: {}]   ;;  %s668_s1 = inlined_call_operand.hbm [shape: bf16[128,128], index: 1, kind: input, shape index: {}]   ;;  %s669_s2 = inlined_call_operand.hbm [shape: f32[4,128], index: 2, kind: input, shape index: {}]   ;;  %s670_s3 = inlined_call_operand.hbm [shape: bf16[128,128], index: 3, kind: input, shape index: {}]   ;;  %s671_s4 = inlined_call_operand.hbm [shape: f32[8,128], index: 4, kind: output, shape index: {}]  }
   0x1   :  { %10 = vsyncpa [#allocation7], 0 }
   0x2   :  { %11 = vsyncpa [#allocation5], 0  ;;  %s569_s15 = smov [#allocation6]   ;;  %s570_s17 = smov [#allocation3]  }
   0x3   :  { %s32_s16 = sshll.u32 %s569_s15, 4  ;;  %s19_s18 = sshll.u32 %s570_s17, 4  ;;  %s33_s16 = int_to_ptr.vmem [resolvable:$true] %s32_s16  ;;  %s603_s18 = int_to_ptr.vmem [resolvable:$true] %s19_s18 }
   0x4   :  { %s475_s21 = scalar_lea.hbm %s669_s2, 64 }
   0x5   :  { %p476_p0 = scmp.ne.s32.totalorder %s669_s2, %s475_s21  ;;  %p479_p1 = scmp.lt.u32.totalorder %s475_s21, %s669_s2 }
   0x7   :  { %p481_p2 = pnand %p479_p1, %p476_p0 }
   0x9   :  { %484 = shalt.err (!%p481_p2)
}
   0xa   :  { %s485_s26 = scalar_lea.vmem %s33_s16, 64  ;;  %p490_p4 = scmp.lt.s32.totalorder %s33_s16, %s33_s16 }
   0xb   :  { %p486_p3 = scmp.ne.s32.totalorder %s33_s16, %s485_s26  ;;  %p491_p5 = scmp.lt.s32.totalorder %s485_s26, %s485_s26 }
   0xd   :  { %p492_p6 = por %p491_p5, %p490_p4 }
   0xf   :  { %p493_p7 = pnand %p492_p6, %p486_p3 }
  0x11   :  { %496 = shalt.err (!%p493_p7)
}
  0x12   :  { %35 = dma.hbm_to_vmem [thread:$0]  %s669_s2, 64, %s33_s16, [#allocation7]  }
  0x13   :  { %s497_s5 = scalar_lea.hbm %s668_s1, 1024 }
  0x14   :  { %p498_p8 = scmp.ne.s32.totalorder %s668_s1, %s497_s5  ;;  %p501_p9 = scmp.lt.u32.totalorder %s497_s5, %s668_s1 }
  0x16   :  { %p503_p10 = pnand %p501_p9, %p498_p8 }
  0x18   :  { %506 = shalt.err (!%p503_p10)
}
  0x19   :  { %s507_s10 = scalar_lea.vmem %s603_s18, 1024  ;;  %p512_p12 = scmp.lt.s32.totalorder %s603_s18, %s603_s18 }
  0x1a   :  { %p508_p11 = scmp.ne.s32.totalorder %s603_s18, %s507_s10  ;;  %p513_p13 = scmp.lt.s32.totalorder %s507_s10, %s507_s10 }
  0x1c   :  { %p514_p0 = por %p513_p13, %p512_p12 }
  0x1e   :  { %p515_p1 = pnand %p514_p0, %p508_p11 }
  0x20   :  { %518 = shalt.err (!%p515_p1)
}
  0x21   :  { %s571_s2 = smov 64   ;;  %s572_s11 = smov 4  }
  0x22   :  { %25 = dma.hbm_to_vmem [thread:$0]  %s668_s1, 1024, %s603_s18, [#allocation4], %s571_s2, %s571_s2, %s572_s11  }
  0x23   :  { %s573_s14 = smov [#allocation8]   ;;  %s519_s19 = scalar_lea.hbm %s670_s3, 1024 }
  0x24   :  { %s41_s15 = sshll.u32 %s573_s14, 4  ;;  %p520_p2 = scmp.ne.s32.totalorder %s670_s3, %s519_s19  ;;  %s42_s15 = int_to_ptr.vmem [resolvable:$true] %s41_s15 }
  0x25   :  { %p523_p3 = scmp.lt.u32.totalorder %s519_s19, %s670_s3 }
  0x27   :  { %p525_p4 = pnand %p523_p3, %p520_p2 }
  0x29   :  { %528 = shalt.err (!%p525_p4)
}
  0x2a   :  { %s529_s24 = scalar_lea.vmem %s42_s15, 1024  ;;  %p534_p6 = scmp.lt.s32.totalorder %s42_s15, %s42_s15 }
  0x2b   :  { %p530_p5 = scmp.ne.s32.totalorder %s42_s15, %s529_s24  ;;  %p535_p7 = scmp.lt.s32.totalorder %s529_s24, %s529_s24 }
  0x2d   :  { %p536_p8 = por %p535_p7, %p534_p6 }
  0x2f   :  { %p537_p9 = pnand %p536_p8, %p530_p5 }
  0x31   :  { %540 = shalt.err (!%p537_p9)
}
  0x32   :  { %47 = dma.hbm_to_vmem [thread:$0]  %s670_s3, 1024, %s42_s15, [#allocation7], %s571_s2, %s571_s2, %s572_s11  }
  0x33   :  { %563 = dma.done.wait [#allocation4], 1024  }
  0x34   :  { %564 = vsyncadd [#allocation4], 4294966272 }
  0x35   :  { %565 = dma.done.wait [#allocation7], 1088  }
  0x36   :  { %566 = vsyncadd [#allocation7], 4294966208  ;;  %v574_v0 = vmov 0.0   ;;  %vm575_vm0 = vmmov 0   ;;  %v451_v1 = vld [vmem:[#allocation3] sm:$0xff]   ;;  %v452_v2 = vld [vmem:[#allocation3 + $0x8] sm:$0xff]   ;;  %v180_v18 = vlaneseq }
  0x37   :  { %402 = vmatprep.subr.bf16.mxu0 %v574_v0  ;;  %418 = vmatprep.mubr.msk.bf16.mxu0 %vm575_vm0, %v574_v0  ;;  %v453_v3 = vld [vmem:[#allocation3 + $0x10] sm:$0xff]   ;;  %v454_v4 = vld [vmem:[#allocation3 + $0x18] sm:$0xff]   ;;  %v455_v5 = vld [vmem:[#allocation3 + $0x20] sm:$0xff]   ;;  %v576_v48 = vmov -1.0  }
  0x38   :  { %422 = vmatprep.subr.bf16.mxu1 %v574_v0  ;;  %438 = vmatprep.mubr.msk.bf16.mxu1 %vm575_vm0, %v574_v0  ;;  %v456_v6 = vld [vmem:[#allocation3 + $0x28] sm:$0xff]   ;;  %v457_v7 = vld [vmem:[#allocation3 + $0x30] sm:$0xff]   ;;  %v458_v8 = vld [vmem:[#allocation3 + $0x38] sm:$0xff]   ;;  %v649_v19 = vshrl.u32 %v180_v18, 7 }
  0x39   :  { %403 = vmatpush3.bf16.msra.mxu0 %v451_v1  ;;  %v58_v9 = vld [vmem:[%s667_s0] sm:$0xf]  ;;  %v459_v10 = vld [vmem:[#allocation8] sm:$0xff]   ;;  %v460_v11 = vld [vmem:[#allocation8 + $0x8] sm:$0xff]   ;;  %s577_s0 = smov [#allocation9]  }
  0x3a   :  { %404 = vmatprep.subr.bf16.mxu0 %v574_v0  ;;  %423 = vmatpush3.bf16.msra.mxu1 %v459_v10  ;;  %v461_v12 = vld [vmem:[#allocation8 + $0x10] sm:$0xff]   ;;  %v462_v13 = vld [vmem:[#allocation8 + $0x18] sm:$0xff]   ;;  %v463_v14 = vld [vmem:[#allocation8 + $0x20] sm:$0xff]   ;;  %v182_v20 = vsub.s32 0, %v649_v19  ;;  %v231_v55 = vsub.s32 1, %v649_v19  ;;  %s358_s26 = sshll.u32 %s577_s0, 4  ;;  %s359_s26 = int_to_ptr.vmem [resolvable:$true] %s358_s26 }
  0x3b   :  { %424 = vmatprep.subr.bf16.mxu1 %v574_v0  ;;  %v464_v15 = vld [vmem:[#allocation8 + $0x28] sm:$0xff]   ;;  %v465_v16 = vld [vmem:[#allocation8 + $0x30] sm:$0xff]   ;;  %v466_v17 = vld [vmem:[#allocation8 + $0x38] sm:$0xff]   ;;  %s541_s27 = scalar_lea.vmem %s359_s26, 128  ;;  %p546_p11 = scmp.lt.s32.totalorder %s359_s26, %s359_s26 }
  0x3c   :  { %v178_v21 = vld [vmem:[#allocation6] sm:$0xf]  ;;  %p542_p10 = scmp.ne.s32.totalorder %s359_s26, %s541_s27  ;;  %p547_p12 = scmp.lt.s32.totalorder %s541_s27, %s541_s27 }
  0x3d   :  { %405 = vmatpush3.bf16.msra.mxu0 %v452_v2  ;;  %v183_v22 = vrot.slane %v178_v21, %v182_v20  ;;  %v232_v56 = vrot.slane %v178_v21, %v231_v55 }
  0x3e   :  { %406 = vmatprep.subr.bf16.mxu0 %v574_v0  ;;  %425 = vmatpush3.bf16.msra.mxu1 %v460_v11  ;;  %p548_p13 = por %p547_p12, %p546_p11 }
  0x3f   :  { %426 = vmatprep.subr.bf16.mxu1 %v574_v0 }
  0x40   :  { %p549_p0 = pnand %p548_p13, %p542_p10 }
  0x41   :  { %407 = vmatpush3.bf16.msra.mxu0 %v453_v3 }
  0x42   :  { %408 = vmatprep.subr.bf16.mxu0 %v574_v0  ;;  %427 = vmatpush3.bf16.msra.mxu1 %v461_v12 }
  0x43   :  { %428 = vmatprep.subr.bf16.mxu1 %v574_v0 }
  0x45   :  { %409 = vmatpush3.bf16.msra.mxu0 %v454_v4 }
  0x46   :  { %410 = vmatprep.subr.bf16.mxu0 %v574_v0  ;;  %429 = vmatpush3.bf16.msra.mxu1 %v462_v13 }
  0x47   :  { %430 = vmatprep.subr.bf16.mxu1 %v574_v0 }
  0x49   :  { %411 = vmatpush3.bf16.msra.mxu0 %v455_v5 }
  0x4a   :  { %412 = vmatprep.subr.bf16.mxu0 %v574_v0  ;;  %431 = vmatpush3.bf16.msra.mxu1 %v463_v14 }
  0x4b   :  { %432 = vmatprep.subr.bf16.mxu1 %v574_v0 }
  0x4d   :  { %413 = vmatpush3.bf16.msra.mxu0 %v456_v6  ;;  %v336_v6 = vsub.s32 2, %v649_v19 }
  0x4e   :  { %414 = vmatprep.subr.bf16.mxu0 %v574_v0  ;;  %433 = vmatpush3.bf16.msra.mxu1 %v464_v15 }
  0x4f   :  { %434 = vmatprep.subr.bf16.mxu1 %v574_v0 }
  0x51   :  { %415 = vmatpush3.bf16.msra.mxu0 %v457_v7  ;;  %v341_v7 = vsub.s32 3, %v649_v19 }
  0x52   :  { %416 = vmatprep.subr.bf16.mxu0 %v574_v0  ;;  %435 = vmatpush3.bf16.msra.mxu1 %v465_v16 }
  0x53   :  { %436 = vmatprep.subr.bf16.mxu1 %v574_v0  ;;  %v342_v11 = vrot.slane %v178_v21, %v341_v7 }
  0x55   :  { %417 = vmatpush3.bf16.msra.mxu0 %v458_v8  ;;  %v337_v8 = vrot.slane %v178_v21, %v336_v6 }
  0x56   :  { %437 = vmatpush3.bf16.msra.mxu1 %v466_v17 }
  0x58   :  { %419 = vmatmul.mubr.bf16.vlgmr.msra.gmra.mrb[0].mxu0 %v58_v9 }
 0x12b   :  { %v157_v23 = vpop.f32.mrb[0].mxu0 }
 0x12c   :  { %v184_v24 = vadd.f32 %v183_v22, %v157_v23  ;;  %v420_v25 = vpop.f32.mrb[1].mxu0 }
 0x12d   :  { %v160_v26 = vpop.f32.mrb[2].mxu0 }
 0x12e   :  { %v186_v27 = vmul.f32 0.70710677, %v184_v24  ;;  %v421_v28 = vpop.f32.mrb[3].mxu0  ;;  %v185_v51 = vmul.f32 0.5, %v184_v24 }
 0x130   :  { %v189_v29 = vand.u32 2147483647, %v186_v27  ;;  %vm187_vm1 = vcmp.ge.f32.partialorder %v186_v27, 0.0 }
 0x131   :  { %v188_v49 = vsel %vm187_vm1, 1.0, %v576_v48 }
 0x132   :  { %v190_v30 = vmul.f32 0.3275911, %v189_v29  ;;  %v203_v32 = vsub.f32 0.0, %v189_v29 }
 0x134   :  { %v191_v31 = vadd.f32 1.0, %v190_v30  ;;  %v204_v34 = vmul.f32 %v203_v32, %v189_v29 }
 0x136   :  { %467 = vrcp.f32 %v191_v31  ;;  %v205_v37 = vmul.f32 1.442695, %v204_v34 }
 0x138   :  { %469 = vpow2.f32 %v205_v37 }
 0x140   :  { %v468_v33 = vpop.eup %467 }
 0x141   :  { %v194_v35 = vmul.f32 1.0614054, %v468_v33 }
 0x142   :  { %v470_v45 = vpop.eup %469 }
 0x143   :  { %v195_v36 = vadd.f32 -1.4531521, %v194_v35 }
 0x145   :  { %v196_v38 = vmul.f32 %v468_v33, %v195_v36 }
 0x147   :  { %v197_v39 = vadd.f32 1.4214138, %v196_v38 }
 0x149   :  { %v198_v40 = vmul.f32 %v468_v33, %v197_v39 }
 0x14b   :  { %v199_v41 = vadd.f32 -0.28449672, %v198_v40 }
 0x14d   :  { %v200_v42 = vmul.f32 %v468_v33, %v199_v41 }
 0x14f   :  { %v201_v43 = vadd.f32 0.2548296, %v200_v42 }
 0x151   :  { %v202_v44 = vmul.f32 %v468_v33, %v201_v43 }
 0x153   :  { %v207_v46 = vmul.f32 %v470_v45, %v202_v44 }
 0x155   :  { %v208_v47 = vsub.f32 1.0, %v207_v46 }
 0x157   :  { %v209_v50 = vmul.f32 %v208_v47, %v188_v49 }
 0x159   :  { %v210_v52 = vadd.f32 1.0, %v209_v50 }
 0x15b   :  { %v211_v53 = vmul.f32 %v210_v52, %v185_v51 }
 0x15d   :  { %v212_v54 = vpack.c.bf16 %v211_v53, %v211_v53 }
 0x15f   :  { %439 = vmatmul.mubr.bf16.vlgmr.msra.gmra.mrb[0].mxu1 %v212_v54 }
 0x232   :  { %v315_v57 = vpop.f32.mrb[0].mxu1 }
 0x233   :  { %v316_v58 = vadd.f32 %v315_v57, %v232_v56  ;;  %v440_v59 = vpop.f32.mrb[1].mxu1 }
 0x234   :  { %v318_v60 = vpop.f32.mrb[2].mxu1 }
 0x235   :  { %v441_v61 = vpop.f32.mrb[3].mxu1  ;;  %v321_v62 = vadd.f32 %v316_v58, %v184_v24 }
 0x237   :  { %322 = vadd.xlane.f32.xlu0 %v321_v62 }
 0x2c4   :  { %v323_v63 = vpop.xlane.xlu0 %322 }
 0x2c5   :  { %v325_v0 = vmul.f32 0.0078125, %v323_v63 }
 0x2c7   :  { %v326_v1 = vsub.f32 %v321_v62, %v325_v0 }
 0x2c9   :  { %v327_v2 = vmul.f32 %v326_v1, %v326_v1 }
 0x2cb   :  { %328 = vadd.xlane.f32.xlu0 %v327_v2 }
 0x358   :  { %v329_v3 = vpop.xlane.xlu0 %328 }
 0x359   :  { %v330_v4 = vmul.f32 0.0078125, %v329_v3 }
 0x35b   :  { %v331_v5 = vadd.f32 1e-05, %v330_v4 }
 0x35d   :  { %471 = vrsqrt.f32 %v331_v5 }
 0x367   :  { %v472_v9 = vpop.eup %471 }
 0x368   :  { %v333_v10 = vmul.f32 %v472_v9, %v326_v1 }
 0x36a   :  { %v338_v12 = vmul.f32 %v337_v8, %v333_v10 }
 0x36c   :  { %v343_v13 = vadd.f32 %v342_v11, %v338_v12 }
 0x36e   :  { %v344_v14 = vmul.f32 %v343_v13, %v343_v13 }
 0x370   :  { %345 = vadd.xlane.f32.xlu1 %v344_v14 }
 0x3fd   :  { %v346_v15 = vpop.xlane.xlu1 %345 }
 0x3fe   :  { %vm347_vm2 = vcmp.gt.f32.partialorder %v346_v15, 0.0 }
 0x3ff   :  { %v348_v16 = vsel %vm347_vm2, %v346_v15, 1.0 }
 0x400   :  { %473 = vrsqrt.f32 %v348_v16 }
 0x40a   :  { %v474_v17 = vpop.eup %473 }
 0x40b   :  { %v350_v18 = vmul.f32 %v474_v17, %v343_v13 }
 0x40d   :  { %351 = vst [vmem:[#allocation9] sm:$0xff] %v350_v18 }
 0x40e   :  { %552 = shalt.err (!%p549_p0)
}
 0x40f   :  { %s553_s30 = scalar_lea.hbm %s671_s4, 128 }
 0x410   :  { %p554_p1 = scmp.ne.s32.totalorder %s671_s4, %s553_s30  ;;  %p557_p2 = scmp.lt.u32.totalorder %s553_s30, %s671_s4 }
 0x412   :  { %p559_p3 = pnand %p557_p2, %p554_p1 }
 0x414   :  { %562 = shalt.err (!%p559_p3)
}
 0x415   :  { %361 = dma.vmem_to_hbm [thread:$0]  %s359_s26, 128, %s671_s4, [#allocation5]  }
 0x416   :  { %567 = dma.done.wait [#allocation5], 128  }
 0x417   :  { %568 = vsyncadd [#allocation5], 4294967168 }
 0x418   :  { %365 = vsyncpa [#allocation4], 1 }
 0x419   :  { %366 = vsyncpa [#allocation7], 1 }
 0x41a   :  { %367 = vsyncpa [#allocation5], 1 }

// kernel: clip_forward.3
= control target key start
LH: loop header
LB: loop body
LE: loop exit
PB: predicated region body
PF: predicated region fallthrough
CT: control target
= control target key end

     0   :  { %s662_s0 = inlined_call_operand.vmem [shape: bf16[8,256], index: 0, kind: input, shape index: {}]   ;;  %s663_s1 = inlined_call_operand.vmem [shape: bf16[256,128], index: 1, kind: input, shape index: {}]   ;;  %s664_s2 = inlined_call_operand.vmem [shape: f32[4,128], index: 2, kind: input, shape index: {}]   ;;  %s665_s3 = inlined_call_operand.vmem [shape: bf16[128,128], index: 3, kind: input, shape index: {}]   ;;  %s666_s4 = inlined_call_operand.hbm [shape: f32[8,128], index: 4, kind: output, shape index: {}]  }
   0x1   :  { %v479_v0 = vld [vmem:[%s663_s1 + $0x40] sm:$0xff]   ;;  %v481_v2 = vld [vmem:[%s663_s1 + $0x48] sm:$0xff]   ;;  %v483_v4 = vld [vmem:[%s663_s1 + $0x50] sm:$0xff]  }
   0x2   :  { %v480_v1 = vld [vmem:[%s663_s1] sm:$0xff]   ;;  %424 = vmatprep.subr.bf16.mxu0 %v479_v0  ;;  %v482_v3 = vld [vmem:[%s663_s1 + $0x8] sm:$0xff]   ;;  %v484_v5 = vld [vmem:[%s663_s1 + $0x10] sm:$0xff]  }
   0x3   :  { %425 = vmatpush3.bf16.msra.mxu0 %v480_v1  ;;  %v485_v6 = vld [vmem:[%s663_s1 + $0x58] sm:$0xff]   ;;  %v487_v8 = vld [vmem:[%s663_s1 + $0x60] sm:$0xff]   ;;  %v489_v10 = vld [vmem:[%s663_s1 + $0x68] sm:$0xff]  }
   0x4   :  { %426 = vmatprep.subr.bf16.mxu0 %v481_v2  ;;  %v486_v7 = vld [vmem:[%s663_s1 + $0x18] sm:$0xff]   ;;  %v488_v9 = vld [vmem:[%s663_s1 + $0x20] sm:$0xff]   ;;  %v490_v12 = vld [vmem:[%s663_s1 + $0x28] sm:$0xff]  }
   0x5   :  { %v19_v11 = vld [vmem:[%s662_s0] sm:$0xff]  ;;  %v491_v14 = vld [vmem:[%s663_s1 + $0x70] sm:$0xff]  }
   0x6   :  { %v399_v13 = vcombine.high %v19_v11, %v19_v11 }
   0x7   :  { %427 = vmatpush3.bf16.msra.mxu0 %v482_v3 }
   0x8   :  { %428 = vmatprep.subr.bf16.mxu0 %v483_v4  ;;  %187 = vmatprep.mubr.bf16.mxu0 %v399_v13 }
   0xb   :  { %429 = vmatpush3.bf16.msra.mxu0 %v484_v5 }
   0xc   :  { %430 = vmatprep.subr.bf16.mxu0 %v485_v6 }
   0xf   :  { %431 = vmatpush3.bf16.msra.mxu0 %v486_v7 }
  0x10   :  { %432 = vmatprep.subr.bf16.mxu0 %v487_v8 }
  0x13   :  { %433 = vmatpush3.bf16.msra.mxu0 %v488_v9 }
  0x14   :  { %434 = vmatprep.subr.bf16.mxu0 %v489_v10 }
  0x15   :  { %9 = vsyncpa [#allocation4], 0  ;;  %v492_v15 = vld [vmem:[%s663_s1 + $0x30] sm:$0xff]   ;;  %v493_v16 = vld [vmem:[%s663_s1 + $0x78] sm:$0xff]   ;;  %v398_v18 = vcombine.low %v19_v11, %v19_v11  ;;  %v537_v20 = vmov 0.0   ;;  %vm538_vm0 = vmmov 0   ;;  %v212_v28 = vlaneseq }
  0x16   :  { %v494_v17 = vld [vmem:[%s663_s1 + $0x38] sm:$0xff]   ;;  %v497_v19 = vld [vmem:[%s665_s3] sm:$0xff]   ;;  %455 = vmatprep.subr.bf16.mxu1 %v537_v20  ;;  %471 = vmatprep.mubr.msk.bf16.mxu1 %vm538_vm0, %v537_v20  ;;  %v498_v21 = vld [vmem:[%s665_s3 + $0x8] sm:$0xff]   ;;  %v539_v59 = vmov -1.0  }
  0x17   :  { %435 = vmatpush3.bf16.msra.mxu0 %v490_v12  ;;  %456 = vmatpush3.bf16.msra.mxu1 %v497_v19  ;;  %v499_v22 = vld [vmem:[%s665_s3 + $0x10] sm:$0xff]   ;;  %v500_v23 = vld [vmem:[%s665_s3 + $0x18] sm:$0xff]   ;;  %v501_v24 = vld [vmem:[%s665_s3 + $0x20] sm:$0xff]   ;;  %v641_v29 = vshrl.u32 %v212_v28, 7 }
  0x18   :  { %436 = vmatprep.subr.bf16.mxu0 %v491_v14  ;;  %457 = vmatprep.subr.bf16.mxu1 %v537_v20  ;;  %v502_v25 = vld [vmem:[%s665_s3 + $0x28] sm:$0xff]   ;;  %v503_v26 = vld [vmem:[%s665_s3 + $0x30] sm:$0xff]   ;;  %v504_v27 = vld [vmem:[%s665_s3 + $0x38] sm:$0xff]  }
  0x19   :  { %v214_v30 = vsub.s32 0, %v641_v29  ;;  %v210_v31 = vld [vmem:[%s664_s2] sm:$0xf]  ;;  %v263_v2 = vsub.s32 1, %v641_v29  ;;  %s540_s2 = smov [#allocation3]  }
  0x1a   :  { %s390_s3 = sshll.u32 %s540_s2, 4  ;;  %s391_s3 = int_to_ptr.vmem [resolvable:$true] %s390_s3 }
  0x1b   :  { %437 = vmatpush3.bf16.msra.mxu0 %v492_v15  ;;  %458 = vmatpush3.bf16.msra.mxu1 %v498_v21  ;;  %v215_v33 = vrot.slane %v210_v31, %v214_v30  ;;  %v264_v3 = vrot.slane %v210_v31, %v263_v2  ;;  %s513_s13 = scalar_lea.vmem %s391_s3, 128  ;;  %p518_p1 = scmp.lt.s32.totalorder %s391_s3, %s391_s3 }
  0x1c   :  { %438 = vmatprep.subr.bf16.mxu0 %v493_v16  ;;  %459 = vmatprep.subr.bf16.mxu1 %v537_v20  ;;  %p514_p0 = scmp.ne.s32.totalorder %s391_s3, %s513_s13  ;;  %p519_p2 = scmp.lt.s32.totalorder %s513_s13, %s513_s13 }
  0x1e   :  { %p520_p3 = por %p519_p2, %p518_p1 }
  0x1f   :  { %439 = vmatpush3.bf16.msra.mxu0 %v494_v17  ;;  %460 = vmatpush3.bf16.msra.mxu1 %v499_v22  ;;  %v368_v17 = vsub.s32 2, %v641_v29 }
  0x20   :  { %461 = vmatprep.subr.bf16.mxu1 %v537_v20  ;;  %p521_p4 = pnand %p520_p3, %p514_p0 }
  0x21   :  { %v369_v19 = vrot.slane %v210_v31, %v368_v17 }
  0x22   :  { %188 = vmatmul.mubr.bf16.vlgmr.msra.gmra.mrb[0].mxu0 %v398_v18  ;;  %v373_v18 = vsub.s32 3, %v641_v29 }
  0x23   :  { %462 = vmatpush3.bf16.msra.mxu1 %v500_v23 }
  0x24   :  { %463 = vmatprep.subr.bf16.mxu1 %v537_v20  ;;  %v374_v22 = vrot.slane %v210_v31, %v373_v18 }
  0x27   :  { %464 = vmatpush3.bf16.msra.mxu1 %v501_v24 }
  0x28   :  { %465 = vmatprep.subr.bf16.mxu1 %v537_v20 }
  0x2b   :  { %466 = vmatpush3.bf16.msra.mxu1 %v502_v25 }
  0x2c   :  { %467 = vmatprep.subr.bf16.mxu1 %v537_v20 }
  0x2f   :  { %468 = vmatpush3.bf16.msra.mxu1 %v503_v26 }
  0x30   :  { %469 = vmatprep.subr.bf16.mxu1 %v537_v20 }
  0x33   :  { %470 = vmatpush3.bf16.msra.mxu1 %v504_v27 }
  0xf5   :  { %v440_v32 = vpop.f32.mrb[0].mxu0 }
  0xf6   :  { %v441_v34 = vpop.f32.mrb[1].mxu0 }
  0xf7   :  { %v442_v35 = vadd.f32 %v441_v34, %v440_v32  ;;  %v443_v36 = vpop.f32.mrb[2].mxu0 }
  0xf8   :  { %v444_v37 = vpop.f32.mrb[3].mxu0 }
  0xf9   :  { %v216_v38 = vadd.f32 %v442_v35, %v215_v33 }
  0xfb   :  { %v218_v39 = vmul.f32 0.70710677, %v216_v38  ;;  %v217_v62 = vmul.f32 0.5, %v216_v38 }
  0xfd   :  { %v221_v40 = vand.u32 2147483647, %v218_v39  ;;  %vm219_vm1 = vcmp.ge.f32.partialorder %v218_v39, 0.0 }
  0xfe   :  { %v220_v60 = vsel %vm219_vm1, 1.0, %v539_v59 }
  0xff   :  { %v222_v41 = vmul.f32 0.3275911, %v221_v40  ;;  %v235_v43 = vsub.f32 0.0, %v221_v40 }
 0x101   :  { %v223_v42 = vadd.f32 1.0, %v222_v41  ;;  %v236_v45 = vmul.f32 %v235_v43, %v221_v40 }
 0x103   :  { %505 = vrcp.f32 %v223_v42  ;;  %v237_v48 = vmul.f32 1.442695, %v236_v45 }
 0x105   :  { %507 = vpow2.f32 %v237_v48 }
 0x10d   :  { %v506_v44 = vpop.eup %505 }
 0x10e   :  { %v226_v46 = vmul.f32 1.0614054, %v506_v44 }
 0x10f   :  { %v508_v56 = vpop.eup %507 }
 0x110   :  { %v227_v47 = vadd.f32 -1.4531521, %v226_v46 }
 0x112   :  { %v228_v49 = vmul.f32 %v506_v44, %v227_v47 }
 0x114   :  { %v229_v50 = vadd.f32 1.4214138, %v228_v49 }
 0x116   :  { %v230_v51 = vmul.f32 %v506_v44, %v229_v50 }
 0x118   :  { %v231_v52 = vadd.f32 -0.28449672, %v230_v51 }
 0x11a   :  { %v232_v53 = vmul.f32 %v506_v44, %v231_v52 }
 0x11c   :  { %v233_v54 = vadd.f32 0.2548296, %v232_v53 }
 0x11e   :  { %v234_v55 = vmul.f32 %v506_v44, %v233_v54 }
 0x120   :  { %v239_v57 = vmul.f32 %v508_v56, %v234_v55 }
 0x122   :  { %v240_v58 = vsub.f32 1.0, %v239_v57 }
 0x124   :  { %v241_v61 = vmul.f32 %v240_v58, %v220_v60 }
 0x126   :  { %v242_v63 = vadd.f32 1.0, %v241_v61 }
 0x128   :  { %v243_v0 = vmul.f32 %v242_v63, %v217_v62 }
 0x12a   :  { %v244_v1 = vpack.c.bf16 %v243_v0, %v243_v0 }
 0x12c   :  { %472 = vmatmul.mubr.bf16.vlgmr.msra.gmra.mrb[0].mxu1 %v244_v1 }
 0x1ff   :  { %v347_v4 = vpop.f32.mrb[0].mxu1 }
 0x200   :  { %v348_v5 = vadd.f32 %v347_v4, %v264_v3  ;;  %v473_v6 = vpop.f32.mrb[1].mxu1 }
 0x201   :  { %v350_v7 = vpop.f32.mrb[2].mxu1 }
 0x202   :  { %v474_v8 = vpop.f32.mrb[3].mxu1  ;;  %v353_v9 = vadd.f32 %v348_v5, %v216_v38 }
 0x204   :  { %354 = vadd.xlane.f32.xlu0 %v353_v9 }
 0x291   :  { %v355_v10 = vpop.xlane.xlu0 %354 }
 0x292   :  { %v357_v11 = vmul.f32 0.0078125, %v355_v10 }
 0x294   :  { %v358_v12 = vsub.f32 %v353_v9, %v357_v11 }
 0x296   :  { %v359_v13 = vmul.f32 %v358_v12, %v358_v12 }
 0x298   :  { %360 = vadd.xlane.f32.xlu0 %v359_v13 }
 0x325   :  { %v361_v14 = vpop.xlane.xlu0 %360 }
 0x326   :  { %v362_v15 = vmul.f32 0.0078125, %v361_v14 }
 0x328   :  { %v363_v16 = vadd.f32 1e-05, %v362_v15 }
 0x32a   :  { %509 = vrsqrt.f32 %v363_v16 }
 0x334   :  { %v510_v20 = vpop.eup %509 }
 0x335   :  { %v365_v21 = vmul.f32 %v510_v20, %v358_v12 }
 0x337   :  { %v370_v23 = vmul.f32 %v369_v19, %v365_v21 }
 0x339   :  { %v375_v24 = vadd.f32 %v374_v22, %v370_v23 }
 0x33b   :  { %v376_v25 = vmul.f32 %v375_v24, %v375_v24 }
 0x33d   :  { %377 = vadd.xlane.f32.xlu1 %v376_v25 }
 0x3ca   :  { %v378_v26 = vpop.xlane.xlu1 %377 }
 0x3cb   :  { %vm379_vm2 = vcmp.gt.f32.partialorder %v378_v26, 0.0 }
 0x3cc   :  { %v380_v27 = vsel %vm379_vm2, %v378_v26, 1.0 }
 0x3cd   :  { %511 = vrsqrt.f32 %v380_v27 }
 0x3d7   :  { %v512_v28 = vpop.eup %511 }
 0x3d8   :  { %v382_v30 = vmul.f32 %v512_v28, %v375_v24 }
 0x3da   :  { %383 = vst [vmem:[#allocation3] sm:$0xff] %v382_v30 }
 0x3db   :  { %524 = shalt.err (!%p521_p4)
}
 0x3dc   :  { %s525_s16 = scalar_lea.hbm %s666_s4, 128 }
 0x3dd   :  { %p526_p5 = scmp.ne.s32.totalorder %s666_s4, %s525_s16  ;;  %p529_p6 = scmp.lt.u32.totalorder %s525_s16, %s666_s4 }
 0x3df   :  { %p531_p7 = pnand %p529_p6, %p526_p5 }
 0x3e1   :  { %534 = shalt.err (!%p531_p7)
}
 0x3e2   :  { %393 = dma.vmem_to_hbm [thread:$0]  %s391_s3, 128, %s666_s4, [#allocation4]  }
 0x3e3   :  { %535 = dma.done.wait [#allocation4], 128  }
 0x3e4   :  { %536 = vsyncadd [#allocation4], 4294967168 }
 0x3e5   :  { %397 = vsyncpa [#allocation4], 1 }

</bundles_post_ra>
